<compile_context>
chip_gen: v7x
topology: tpu7x:2x2x1
jax: 0.10.0
libtpu: 0.0.40
codegen_flags: <defaults>
</compile_context>

<pallas_src>
import math
from functools import partial

import jax
import jax.numpy as jnp
from jax import lax
from jax.experimental import pallas as pl
from jax.experimental.pallas import tpu as pltpu


def _round_up(v, m):
    return ((v + m - 1) // m) * m


def mlp_kernel(x_ref, w1_ref, b1_ref, w2_ref, b2_ref, o_ref, acc_ref):
    k = pl.program_id(1)

    @pl.when(k == 0)
    def _():
        # Fold b2 into the accumulator init (removes a (tm, D) add at finalize).
        acc_ref[...] = jnp.broadcast_to(
            b2_ref[...].astype(jnp.float32), acc_ref.shape)

    x = x_ref[...]                                             # (tm, D)
    # First linear chunk: (tm, D) @ (D, tn), f32 accumulation on the MXU.
    h = jnp.dot(x, w1_ref[...], preferred_element_type=jnp.float32)
    h = h + b1_ref[...].astype(jnp.float32)                    # (1, tn) bcast
    # Exact erf GELU (matches PyTorch nn.GELU default) in f32.
    # TODO(synk): tanh-approx GELU would route through EUP (free slot on v5e)
    # but changes numerics vs PyTorch's default, so it stays exact here.
    h = 0.5 * h * (1.0 + lax.erf(h * (1.0 / math.sqrt(2.0))))
    # Second linear partial: (tm, tn) @ (tn, D) accumulated into f32 scratch.
    acc_ref[...] += jnp.dot(h.astype(x.dtype), w2_ref[...],
                            preferred_element_type=jnp.float32)

    @pl.when(k == pl.num_programs(1) - 1)
    def _():
        o_ref[...] = acc_ref[...].astype(o_ref.dtype)


@partial(jax.jit, static_argnames=("tm", "tn"))
def mlp_pallas(x, w1, b1, w2, b2, *, tm=None, tn=None):
    # x: (..., D); flatten leading dims into rows.
    orig_shape = x.shape
    D = orig_shape[-1]
    H = w1.shape[1]
    x2 = x.reshape(-1, D)
    M = x2.shape[0]

    # Row alignment: bf16 packs two rows per sublane -> 16; f32 -> 8.
    row_align = 16 if x.dtype == jnp.bfloat16 else 8

    # Default tiles: big row tile (256) for MXU occupancy / per-step overhead
    # amortization, but don't over-pad toy shapes. H tiled in 512-wide chunks
    # so weight tiles stream through VMEM instead of requiring full W1/W2
    # residency (which would not fit on v7x's 64 MiB VMEM for real widths).
    if tm is None:
        tm = min(256, _round_up(M, row_align))
    if tn is None:
        tn = min(512, _round_up(H, 128))

    Mp = _round_up(M, tm)                  # pad rows instead of asserting
    Dp = _round_up(D, 128)                 # lane-dense output stores
    Hp = _round_up(H, tn)

    x2p = jnp.pad(x2, ((0, Mp - M), (0, Dp - D)))
    w1p = jnp.pad(w1, ((0, Dp - D), (0, Hp - H)))
    b1p = jnp.pad(b1, (0, Hp - H)).reshape(1, Hp)
    w2p = jnp.pad(w2, ((0, Hp - H), (0, Dp - D)))
    b2p = jnp.pad(b2, (0, Dp - D)).reshape(1, Dp)

    grid = (Mp // tm, Hp // tn)

    # Rough VMEM budget (double-buffered inputs/outputs + f32 accumulator);
    # clamp so the same kernel stays inside v7x's 64 MiB physical VMEM.
    itemsize = x.dtype.itemsize
    est = (2 * (tm * Dp + Dp * tn + tn + tn * Dp + Dp + tm * Dp) * itemsize
           + tm * Dp * 4)
    vmem_limit = int(min(max(2 * est, 16 * 1024 * 1024), 64 * 1024 * 1024))

    cost = pl.CostEstimate(
        flops=4 * M * D * H,               # two matmuls, mult+add
        transcendentals=M * H,             # erf per hidden activation
        bytes_accessed=(x2p.size + w1p.size + b1p.size + w2p.size + b2p.size
                        + Mp * Dp) * itemsize,
    )

    out = pl.pallas_call(
        mlp_kernel,
        out_shape=jax.ShapeDtypeStruct((Mp, Dp), x.dtype),
        grid_spec=pltpu.PrefetchScalarGridSpec(
            num_scalar_prefetch=0,
            grid=grid,
            in_specs=[
                pl.BlockSpec((tm, Dp), lambda i, k: (i, 0)),   # x rows
                pl.BlockSpec((Dp, tn), lambda i, k: (0, k)),   # W1 chunk
                pl.BlockSpec((1, tn), lambda i, k: (0, k)),    # b1 chunk
                pl.BlockSpec((tn, Dp), lambda i, k: (k, 0)),   # W2 chunk
                pl.BlockSpec((1, Dp), lambda i, k: (0, 0)),    # b2
            ],
            out_specs=pl.BlockSpec((tm, Dp), lambda i, k: (i, 0)),
            scratch_shapes=[pltpu.VMEM((tm, Dp), jnp.float32)],
        ),
        compiler_params=pltpu.CompilerParams(
            dimension_semantics=("parallel", "arbitrary"),
            vmem_limit_bytes=vmem_limit),
        cost_estimate=cost,
    )(x2p, w1p, b1p, w2p, b2p)

    return out[:M, :D].reshape(orig_shape)


def init_params(key, dim, hidden_size, dtype=jnp.float32):
    # Deterministic init mimicking nn.Linear's uniform(-1/sqrt(fan_in), ...).
    k1, k2, k3, k4 = jax.random.split(key, 4)
    lim1 = 1.0 / math.sqrt(dim)
    lim2 = 1.0 / math.sqrt(hidden_size)
    # Weights stored already transposed to (in, out) so the kernel does x @ W.
    w1 = jax.random.uniform(k1, (dim, hidden_size), dtype, -lim1, lim1)
    b1 = jax.random.uniform(k2, (hidden_size,), dtype, -lim1, lim1)
    w2 = jax.random.uniform(k3, (hidden_size, dim), dtype, -lim2, lim2)
    b2 = jax.random.uniform(k4, (dim,), dtype, -lim2, lim2)
    return w1, b1, w2, b2


def mlp_reference(x, w1, b1, w2, b2):
    h = x @ w1 + b1
    h = 0.5 * h * (1.0 + lax.erf(h / jnp.sqrt(2.0)))
    return h @ w2 + b2


if __name__ == "__main__":
    key = jax.random.PRNGKey(0)
    kx, kp = jax.random.split(key)

    batch, seq, dim, hidden = 2, 8, 32, 64
    x = jax.random.normal(kx, (batch, seq, dim), jnp.float32)
    w1, b1, w2, b2 = init_params(kp, dim, hidden)

    out = mlp_pallas(x, w1, b1, w2, b2)
    out = jax.block_until_ready(out)

    ref = mlp_reference(x, w1, b1, w2, b2)
    assert out.shape == x.shape
    assert jnp.allclose(out, ref, rtol=1e-5, atol=1e-5), "mismatch vs reference"

    print("KERNEL_OK")
</pallas_src>

<mosaic_0001>
module attributes {stable_mosaic.version = 11 : i64} {
  func.func @mlp_kernel(%arg0: i32, %arg1: i32, %arg2: memref<16x128xf32, #tpu.memory_space<vmem>>, %arg3: memref<128x128xf32, #tpu.memory_space<vmem>>, %arg4: memref<1x128xf32, #tpu.memory_space<vmem>>, %arg5: memref<128x128xf32, #tpu.memory_space<vmem>>, %arg6: memref<1x128xf32, #tpu.memory_space<vmem>>, %arg7: memref<16x128xf32, #tpu.memory_space<vmem>>, %arg8: memref<16x128xf32, #tpu.memory_space<vmem>>) attributes {dimension_semantics = [#tpu.dimension_semantics<parallel>, #tpu.dimension_semantics<arbitrary>], iteration_bounds = array<i64: 1, 1>, scalar_prefetch = 0 : i64, scratch_operands = 1 : i64, tpu.core_type = #tpu.core_type<tc>, window_params = [{transform_indices = @transform_0, window_bounds = array<i64: 16, 128>}, {transform_indices = @transform_1, window_bounds = array<i64: 128, 128>}, {transform_indices = @transform_2, window_bounds = array<i64: 1, 128>}, {transform_indices = @transform_3, window_bounds = array<i64: 128, 128>}, {pipeline_mode = #tpu.pipeline_mode<synchronous>, transform_indices = @transform_4, window_bounds = array<i64: 1, 128>}, {transform_indices = @transform_5, window_bounds = array<i64: 16, 128>}]} {
    %c0_i32 = arith.constant 0 : i32
    %0 = arith.cmpi eq, %arg1, %c0_i32 : i32
    %1 = arith.extui %0 : i1 to i32
    %c0_i32_0 = arith.constant 0 : i32
    %2 = arith.cmpi ne, %1, %c0_i32_0 : i32
    scf.if %2 {
      %c0_18 = arith.constant 0 : index
      %c0_19 = arith.constant 0 : index
      %25 = vector.load %arg6[%c0_18, %c0_19] : memref<1x128xf32, #tpu.memory_space<vmem>>, vector<1x128xf32>
      %26 = vector.shape_cast %25 : vector<1x128xf32> to vector<1x128xf32>
      %27 = vector.broadcast %26 : vector<1x128xf32> to vector<16x128xf32>
      %c0_20 = arith.constant 0 : index
      %c0_21 = arith.constant 0 : index
      %28 = vector.load %arg8[%c0_20, %c0_21] : memref<16x128xf32, #tpu.memory_space<vmem>>, vector<16x128xf32>
      tpu.vector_store %arg8[%c0_20, %c0_21], %27 {strides = array<i32>} : memref<16x128xf32, #tpu.memory_space<vmem>>, vector<16x128xf32>,
    } else {
    }
    %c0 = arith.constant 0 : index
    %c0_1 = arith.constant 0 : index
    %3 = vector.load %arg2[%c0, %c0_1] : memref<16x128xf32, #tpu.memory_space<vmem>>, vector<16x128xf32>
    %c0_2 = arith.constant 0 : index
    %c0_3 = arith.constant 0 : index
    %4 = vector.load %arg3[%c0_2, %c0_3] : memref<128x128xf32, #tpu.memory_space<vmem>>, vector<128x128xf32>
    %cst = arith.constant dense<0.000000e+00> : vector<16x128xf32>
    %5 = tpu.matmul %3, %4, %cst {dimension_numbers = #tpu.dot_dimension_numbers<[1], [0], [0], [1], [0, 0, 1, 1], [], []>} : vector<16x128xf32>, vector<128x128xf32>, vector<16x128xf32> -> vector<16x128xf32>
    %c0_4 = arith.constant 0 : index
    %c0_5 = arith.constant 0 : index
    %6 = vector.load %arg4[%c0_4, %c0_5] : memref<1x128xf32, #tpu.memory_space<vmem>>, vector<1x128xf32>
    %7 = vector.broadcast %6 : vector<1x128xf32> to vector<16x128xf32>
    %8 = arith.addf %5, %7 : vector<16x128xf32>
    %cst_6 = arith.constant 5.000000e-01 : f32
    %9 = vector.broadcast %cst_6 : f32 to vector<16x128xf32>
    %10 = arith.mulf %9, %8 : vector<16x128xf32>
    %cst_7 = arith.constant 0.707106769 : f32
    %11 = vector.broadcast %cst_7 : f32 to vector<16x128xf32>
    %12 = arith.mulf %8, %11 : vector<16x128xf32>
    %13 = math.erf %12 : vector<16x128xf32>
    %cst_8 = arith.constant 1.000000e+00 : f32
    %14 = vector.broadcast %cst_8 : f32 to vector<16x128xf32>
    %15 = arith.addf %14, %13 : vector<16x128xf32>
    %16 = arith.mulf %10, %15 : vector<16x128xf32>
    %c0_9 = arith.constant 0 : index
    %c0_10 = arith.constant 0 : index
    %17 = vector.load %arg8[%c0_9, %c0_10] : memref<16x128xf32, #tpu.memory_space<vmem>>, vector<16x128xf32>
    %c0_11 = arith.constant 0 : index
    %c0_12 = arith.constant 0 : index
    %18 = vector.load %arg5[%c0_11, %c0_12] : memref<128x128xf32, #tpu.memory_space<vmem>>, vector<128x128xf32>
    %cst_13 = arith.constant dense<0.000000e+00> : vector<16x128xf32>
    %19 = tpu.matmul %16, %18, %cst_13 {dimension_numbers = #tpu.dot_dimension_numbers<[1], [0], [0], [1], [0, 0, 1, 1], [], []>} : vector<16x128xf32>, vector<128x128xf32>, vector<16x128xf32> -> vector<16x128xf32>
    %20 = arith.addf %17, %19 : vector<16x128xf32>
    %c0_14 = arith.constant 0 : index
    %c0_15 = arith.constant 0 : index
    %21 = vector.load %arg8[%c0_14, %c0_15] : memref<16x128xf32, #tpu.memory_space<vmem>>, vector<16x128xf32>
    tpu.vector_store %arg8[%c0_14, %c0_15], %20 {strides = array<i32>} : memref<16x128xf32, #tpu.memory_space<vmem>>, vector<16x128xf32>,
    %c0_i32_16 = arith.constant 0 : i32
    %22 = arith.cmpi eq, %arg1, %c0_i32_16 : i32
    %23 = arith.extui %22 : i1 to i32
    %c0_i32_17 = arith.constant 0 : i32
    %24 = arith.cmpi ne, %23, %c0_i32_17 : i32
    scf.if %24 {
      %c0_18 = arith.constant 0 : index
      %c0_19 = arith.constant 0 : index
      %25 = vector.load %arg8[%c0_18, %c0_19] : memref<16x128xf32, #tpu.memory_space<vmem>>, vector<16x128xf32>
      %c0_20 = arith.constant 0 : index
      %c0_21 = arith.constant 0 : index
      %26 = vector.load %arg7[%c0_20, %c0_21] : memref<16x128xf32, #tpu.memory_space<vmem>>, vector<16x128xf32>
      tpu.vector_store %arg7[%c0_20, %c0_21], %25 {strides = array<i32>} : memref<16x128xf32, #tpu.memory_space<vmem>>, vector<16x128xf32>,
    } else {
    }
    return
  }
  func.func @transform_0(%arg0: i32, %arg1: i32) -> (i32, i32) {
    %c0_i32 = arith.constant 0 : i32
    %c0_i32_0 = arith.constant 0 : i32
    return %arg0, %c0_i32 : i32, i32
  }
  func.func @transform_1(%arg0: i32, %arg1: i32) -> (i32, i32) {
    %c0_i32 = arith.constant 0 : i32
    %c0_i32_0 = arith.constant 0 : i32
    return %c0_i32, %arg1 : i32, i32
  }
  func.func @transform_2(%arg0: i32, %arg1: i32) -> (i32, i32) {
    %c0_i32 = arith.constant 0 : i32
    %c0_i32_0 = arith.constant 0 : i32
    return %c0_i32, %arg1 : i32, i32
  }
  func.func @transform_3(%arg0: i32, %arg1: i32) -> (i32, i32) {
    %c0_i32 = arith.constant 0 : i32
    %c0_i32_0 = arith.constant 0 : i32
    return %arg1, %c0_i32 : i32, i32
  }
  func.func @transform_4(%arg0: i32, %arg1: i32) -> (i32, i32) {
    %c0_i32 = arith.constant 0 : i32
    %c0_i32_0 = arith.constant 0 : i32
    %c0_i32_1 = arith.constant 0 : i32
    return %c0_i32, %c0_i32_0 : i32, i32
  }
  func.func @transform_5(%arg0: i32, %arg1: i32) -> (i32, i32) {
    %c0_i32 = arith.constant 0 : i32
    %c0_i32_0 = arith.constant 0 : i32
    return %arg0, %c0_i32 : i32, i32
  }
}

</mosaic_0001>

<bundles_post_ra>
// kernel: mlp_pallas.1
= control target key start
LH: loop header
LB: loop body
LE: loop exit
PB: predicated region body
PF: predicated region fallthrough
CT: control target
= control target key end

     0   :  { %s571_s1 = inlined_call_operand.vmem [shape: f32[128,128], index: 1, kind: input, shape index: {}]   ;;  %s572_s0 = inlined_call_operand.vmem [shape: f32[16,128], index: 0, kind: input, shape index: {}]   ;;  %s573_s3 = inlined_call_operand.vmem [shape: f32[128,128], index: 3, kind: input, shape index: {}]   ;;  %s574_s2 = inlined_call_operand.vmem [shape: f32[1,128], index: 2, kind: input, shape index: {}]   ;;  %s575_s4 = inlined_call_operand.vmem [shape: f32[1,128], index: 4, kind: input, shape index: {}]   ;;  %s576_s5 = inlined_call_operand.vmem [shape: f32[16,128], index: 5, kind: output, shape index: {}]  }
   0x1   :  { %v35_v0 = vld [vmem:[%s571_s1] sm:$0xff]  ;;  %v36_v1 = vld [vmem:[%s571_s1 + $0x8] sm:$0xff]  ;;  %v37_v2 = vld [vmem:[%s571_s1 + $0x10] sm:$0xff] }
   0x2   :  { %v359_v3 = vpack.c.bf16 %v36_v1, %v35_v0  ;;  %v38_v4 = vld [vmem:[%s571_s1 + $0x18] sm:$0xff]  ;;  %v39_v6 = vld [vmem:[%s571_s1 + $0x20] sm:$0xff]  ;;  %v40_v7 = vld [vmem:[%s571_s1 + $0x28] sm:$0xff] }
   0x3   :  { %v363_v5 = vpack.c.bf16 %v38_v4, %v37_v2  ;;  %v367_v8 = vpack.c.bf16 %v40_v7, %v39_v6  ;;  %v41_v9 = vld [vmem:[%s571_s1 + $0x30] sm:$0xff]  ;;  %v42_v10 = vld [vmem:[%s571_s1 + $0x38] sm:$0xff]  ;;  %v33_v11 = vld [vmem:[%s572_s0] sm:$0xff] }
   0x4   :  { %360 = vmatprep.subr.bf16.mxu0 %v359_v3  ;;  %321 = vmatprep.mubr.f32.mxu0 %v33_v11  ;;  %v145_v12 = vld [vmem:[%s573_s3] sm:$0xff]  ;;  %v146_v13 = vld [vmem:[%s573_s3 + $0x8] sm:$0xff]  ;;  %v147_v14 = vld [vmem:[%s573_s3 + $0x10] sm:$0xff]  ;;  %v371_v20 = vpack.c.bf16 %v42_v10, %v41_v9 }
   0x5   :  { %362 = vmatpush3.bf16.msra.mxu0 %v359_v3  ;;  %v391_v15 = vpack.c.bf16 %v146_v13, %v145_v12  ;;  %v148_v16 = vld [vmem:[%s573_s3 + $0x18] sm:$0xff]  ;;  %v149_v18 = vld [vmem:[%s573_s3 + $0x20] sm:$0xff]  ;;  %v150_v19 = vld [vmem:[%s573_s3 + $0x28] sm:$0xff] }
   0x6   :  { %364 = vmatprep.subr.bf16.mxu0 %v363_v5  ;;  %v395_v17 = vpack.c.bf16 %v148_v16, %v147_v14  ;;  %v43_v21 = vld [vmem:[%s571_s1 + $0x40] sm:$0xff]  ;;  %v44_v22 = vld [vmem:[%s571_s1 + $0x48] sm:$0xff]  ;;  %v399_v23 = vpack.c.bf16 %v150_v19, %v149_v18  ;;  %v45_v25 = vld [vmem:[%s571_s1 + $0x50] sm:$0xff] }
   0x7   :  { %392 = vmatprep.subr.bf16.mxu1 %v391_v15  ;;  %v375_v24 = vpack.c.bf16 %v44_v22, %v43_v21  ;;  %v46_v26 = vld [vmem:[%s571_s1 + $0x58] sm:$0xff]  ;;  %v47_v28 = vld [vmem:[%s571_s1 + $0x60] sm:$0xff]  ;;  %v48_v29 = vld [vmem:[%s571_s1 + $0x68] sm:$0xff] }
   0x8   :  { %394 = vmatpush3.bf16.msra.mxu1 %v391_v15  ;;  %v379_v27 = vpack.c.bf16 %v46_v26, %v45_v25  ;;  %v383_v30 = vpack.c.bf16 %v48_v29, %v47_v28  ;;  %v49_v31 = vld [vmem:[%s571_s1 + $0x70] sm:$0xff]  ;;  %v50_v32 = vld [vmem:[%s571_s1 + $0x78] sm:$0xff]  ;;  %v34_v34 = vld [vmem:[%s572_s0 + $0x8] sm:$0xff] }
   0x9   :  { %366 = vmatpush3.bf16.msra.mxu0 %v363_v5  ;;  %396 = vmatprep.subr.bf16.mxu1 %v395_v17  ;;  %v387_v33 = vpack.c.bf16 %v50_v32, %v49_v31  ;;  %v151_v35 = vld [vmem:[%s573_s3 + $0x30] sm:$0xff]  ;;  %v152_v36 = vld [vmem:[%s573_s3 + $0x38] sm:$0xff]  ;;  %v153_v38 = vld [vmem:[%s573_s3 + $0x40] sm:$0xff] }
   0xa   :  { %368 = vmatprep.subr.bf16.mxu0 %v367_v8  ;;  %v403_v37 = vpack.c.bf16 %v152_v36, %v151_v35  ;;  %v154_v39 = vld [vmem:[%s573_s3 + $0x48] sm:$0xff]  ;;  %v155_v41 = vld [vmem:[%s573_s3 + $0x50] sm:$0xff]  ;;  %v156_v42 = vld [vmem:[%s573_s3 + $0x58] sm:$0xff] }
   0xb   :  { %v407_v40 = vpack.c.bf16 %v154_v39, %v153_v38  ;;  %v411_v43 = vpack.c.bf16 %v156_v42, %v155_v41  ;;  %v157_v44 = vld [vmem:[%s573_s3 + $0x60] sm:$0xff]  ;;  %v158_v45 = vld [vmem:[%s573_s3 + $0x68] sm:$0xff]  ;;  %v159_v47 = vld [vmem:[%s573_s3 + $0x70] sm:$0xff] }
   0xc   :  { %398 = vmatpush3.bf16.msra.mxu1 %v395_v17  ;;  %v415_v46 = vpack.c.bf16 %v158_v45, %v157_v44  ;;  %v160_v48 = vld [vmem:[%s573_s3 + $0x78] sm:$0xff]  ;;  %v252_v50 = vld [vmem:[%s574_s2] ss:$0 sm:$0xff] }
   0xd   :  { %370 = vmatpush3.bf16.msra.mxu0 %v367_v8  ;;  %400 = vmatprep.subr.bf16.mxu1 %v399_v23  ;;  %v419_v49 = vpack.c.bf16 %v160_v48, %v159_v47  ;;  %v251_v1 = vld [vmem:[%s575_s4] ss:$0 sm:$0xff] }
   0xe   :  { %372 = vmatprep.subr.bf16.mxu0 %v371_v20 }
  0x10   :  { %402 = vmatpush3.bf16.msra.mxu1 %v399_v23 }
  0x11   :  { %374 = vmatpush3.bf16.msra.mxu0 %v371_v20  ;;  %404 = vmatprep.subr.bf16.mxu1 %v403_v37 }
  0x12   :  { %376 = vmatprep.subr.bf16.mxu0 %v375_v24 }
  0x14   :  { %406 = vmatpush3.bf16.msra.mxu1 %v403_v37 }
  0x15   :  { %378 = vmatpush3.bf16.msra.mxu0 %v375_v24  ;;  %408 = vmatprep.subr.bf16.mxu1 %v407_v40 }
  0x16   :  { %380 = vmatprep.subr.bf16.mxu0 %v379_v27 }
  0x18   :  { %410 = vmatpush3.bf16.msra.mxu1 %v407_v40 }
  0x19   :  { %382 = vmatpush3.bf16.msra.mxu0 %v379_v27  ;;  %412 = vmatprep.subr.bf16.mxu1 %v411_v43 }
  0x1a   :  { %384 = vmatprep.subr.bf16.mxu0 %v383_v30 }
  0x1c   :  { %414 = vmatpush3.bf16.msra.mxu1 %v411_v43 }
  0x1d   :  { %386 = vmatpush3.bf16.msra.mxu0 %v383_v30  ;;  %416 = vmatprep.subr.bf16.mxu1 %v415_v46 }
  0x1e   :  { %388 = vmatprep.subr.bf16.mxu0 %v387_v33 }
  0x20   :  { %418 = vmatpush3.bf16.msra.mxu1 %v415_v46 }
  0x21   :  { %390 = vmatpush3.bf16.msra.mxu0 %v387_v33  ;;  %420 = vmatprep.subr.bf16.mxu1 %v419_v49 }
  0x24   :  { %322 = vmatmul.mubr.f32.vlgmr.msra.gmra.mrb[0].mxu0 %v34_v34  ;;  %422 = vmatpush3.bf16.msra.mxu1 %v419_v49 }
  0xf7   :  { %v323_v51 = vpop.f32.mrb[0].mxu0 }
  0xf8   :  { %v130_v52 = vadd.f32 %v323_v51, %v252_v50  ;;  %v124_v53 = vpop.f32.mrb[1].mxu0 }
  0xf9   :  { %v125_v54 = vadd.f32 %v252_v50, %v124_v53 }
  0xfa   :  { %v136_v55 = vmul.f32 0.70710677, %v130_v52  ;;  %v134_v62 = vmul.f32 0.5, %v130_v52 }
  0xfb   :  { %v135_v56 = vmul.f32 0.70710677, %v125_v54  ;;  %v133_v60 = vmul.f32 0.5, %v125_v54 }
  0xfc   :  { %423 = verf.f32 %v136_v55 }
  0xfd   :  { %425 = verf.f32 %v135_v56 }
 0x106   :  { %v424_v57 = vpop.eup %423 }
 0x107   :  { %v426_v58 = vpop.eup %425  ;;  %v140_v59 = vadd.f32 1.0, %v424_v57 }
 0x108   :  { %v139_v61 = vadd.f32 1.0, %v426_v58 }
 0x109   :  { %v142_v0 = vmul.f32 %v140_v59, %v134_v62 }
 0x10a   :  { %v141_v63 = vmul.f32 %v139_v61, %v133_v60 }
 0x10c   :  { %356 = vmatprep.mubr.f32.mxu1 %v141_v63 }
 0x10d   :  { %357 = vmatmul.mubr.f32.vlgmr.msra.gmra.mrb[0].mxu1 %v142_v0 }
 0x1e0   :  { %v358_v2 = vpop.f32.mrb[0].mxu1 }
 0x1e1   :  { %v237_v3 = vadd.f32 %v358_v2, %v251_v1  ;;  %v227_v4 = vpop.f32.mrb[1].mxu1 }
 0x1e2   :  { %v236_v5 = vadd.f32 %v251_v1, %v227_v4 }
 0x1e3   :  { %246 = vst [vmem:[%s576_s5 + $0x8] sm:$0xff] %v237_v3 }
 0x1e4   :  { %245 = vst [vmem:[%s576_s5] sm:$0xff] %v236_v5 }

</bundles_post_ra>
